<compile_context>
chip_gen: v7x
topology: tpu7x:2x2x1
jax: 0.10.0
libtpu: 0.0.40
codegen_flags: <defaults>
</compile_context>

<pallas_src>
import jax
import jax.numpy as jnp
from jax.experimental import pallas as pl
from jax.experimental.pallas import tpu as pltpu

LANE = 128      # vreg lane width (last dim)
SUBLANE = 8     # vreg sublane width (second-to-last dim)


def _round_up(n, m):
    return ((n + m - 1) // m) * m


def mlp_kernel(x_ref, w1_ref, b1_ref, w2_ref, b2_ref, w3_ref, b3_ref, o_ref):
    """Fused Linear->ReLU->Linear->ReLU->Linear->Sigmoid on one (tb, d_in) batch tile.

    Params are grid-invariant (VMEM-resident across batch tiles). Matmuls run on the MXU in
    the weights' dtype with f32 accumulation; bias/ReLU/sigmoid epilogue stays in f32.
    """
    x = x_ref[...].astype(w1_ref.dtype)                  # in-kernel cast to the MXU dtype
    h1 = jnp.dot(x, w1_ref[...], preferred_element_type=jnp.float32)
    h1 = jnp.maximum(h1 + b1_ref[...], 0.0)              # ReLU (f32, VPU)

    h2 = jnp.dot(h1.astype(w2_ref.dtype), w2_ref[...], preferred_element_type=jnp.float32)
    h2 = jnp.maximum(h2 + b2_ref[...], 0.0)              # ReLU (f32, VPU)

    logits = jnp.dot(h2.astype(w3_ref.dtype), w3_ref[...], preferred_element_type=jnp.float32)
    logits = logits + b3_ref[...]

    # sigmoid(x) = 0.5 * tanh(x/2) + 0.5 -> tanh goes to the EUP (free slot vs a VALU divide)
    # and avoids the inf intermediate of 1/(1+exp(-x)) for very negative logits.
    o_ref[...] = (0.5 * jnp.tanh(0.5 * logits) + 0.5).astype(o_ref.dtype)


def prepare_params(params, *, mxu_dtype=jnp.bfloat16):
    """One-time pad/cast of TorchModel params (call once at init, NOT every forward).

    Only the hidden dimension is lane-padded to 128; zero padding is exact through
    bias-add(0) -> ReLU -> matmul.  d_in and d_out stay at their true widths.
    Weights are cast to `mxu_dtype`; biases stay f32 (added post-accumulation).
    """
    w1, b1, w2, b2, w3, b3 = (params[k] for k in ("w1", "b1", "w2", "b2", "w3", "b3"))
    d_in, h = w1.shape
    d_out = w3.shape[1]
    h_p = _round_up(h, LANE)

    def pad2(a, rows, cols, dtype):
        return jnp.pad(a, ((0, rows - a.shape[0]), (0, cols - a.shape[1]))).astype(dtype)

    return dict(
        w1=pad2(w1, d_in, h_p, mxu_dtype),
        w2=pad2(w2, h_p, h_p, mxu_dtype),
        w3=pad2(w3, h_p, d_out, mxu_dtype),
        b1=pad2(b1, 1, h_p, jnp.float32),
        b2=pad2(b2, 1, h_p, jnp.float32),
        b3=pad2(b3, 1, d_out, jnp.float32),
    )


def torch_model_forward(x, prepared, *, block_b=2048, min_grid_steps=2):
    """x: (B, input_size) float32. `prepared`: output of prepare_params()."""
    w1, b1, w2, b2, w3, b3 = (prepared[k] for k in ("w1", "b1", "w2", "b2", "w3", "b3"))
    B, d_in = x.shape
    assert w1.shape[0] == d_in, "input feature dim mismatch"
    h_p = w2.shape[0]
    d_out = w3.shape[1]

    # Batch tiling: near-equal tiles, 8-row aligned; >= min_grid_steps tiles when the batch
    # allows it so both TensorCores get work on v7x (grid axis is "parallel").
    block_b = max(SUBLANE, _round_up(block_b, SUBLANE))
    n_tiles = pl.cdiv(B, block_b)
    if B >= min_grid_steps * SUBLANE:
        n_tiles = max(n_tiles, min_grid_steps)
    tb = _round_up(pl.cdiv(B, n_tiles), SUBLANE)
    b_p = n_tiles * tb

    x_p = x if b_p == B else jnp.pad(x, ((0, b_p - B), (0, 0)))

    # Grid-invariant (VMEM-resident) params: block index never changes, so a single buffer
    # suffices -> halves their VMEM footprint (matters on v7x's 64 MiB VMEM).
    def resident(shape):
        return pl.BlockSpec(shape, lambda i: (0, 0), pipeline_mode=pl.Buffered(1))

    # Explicit VMEM budget: resident params + double-buffered x/out tiles + f32 intermediates.
    w_itemsize = jnp.dtype(w1.dtype).itemsize
    param_bytes = (w1.size + w2.size + w3.size) * w_itemsize \
        + (b1.size + b2.size + b3.size) * 4
    io_bytes = 2 * tb * (d_in * jnp.dtype(x.dtype).itemsize + d_out * 4)
    work_bytes = 3 * tb * h_p * 4
    vmem_limit = int(min(max(2 * (param_bytes + io_bytes + work_bytes) + (4 << 20), 16 << 20),
                         48 << 20))

    cost = pl.CostEstimate(
        flops=2 * B * (d_in * h_p + h_p * h_p + h_p * d_out),
        transcendentals=B * d_out,                                    # tanh per output elem
        bytes_accessed=int(B * d_in * jnp.dtype(x.dtype).itemsize
                           + B * d_out * 4 + param_bytes),
    )

    # NOTE: for large hidden sizes (h_p x h_p weight approaching VMEM), split the layer-2
    # contraction over an extra "arbitrary" K grid axis with an f32 accumulator; choose the
    # K tile as a multiple of 256 on v6e/v7x (128 on v5e) and keep N tiles >= 256 there.
    out_p = pl.pallas_call(
        mlp_kernel,
        out_shape=jax.ShapeDtypeStruct((b_p, d_out), jnp.float32),
        grid=(n_tiles,),
        in_specs=[
            pl.BlockSpec((tb, d_in), lambda i: (i, 0)),     # x: batch-tiled, K at true width
            resident((d_in, h_p)), resident((1, h_p)),      # layer 1 params
            resident((h_p, h_p)), resident((1, h_p)),       # layer 2 params
            resident((h_p, d_out)), resident((1, d_out)),   # layer 3 params
        ],
        # True-width output (d_out columns): ~32x less HBM writeback than a 128-lane-padded
        # f32 tile; the masked-store cost is negligible vs. the DMA bytes saved.
        out_specs=pl.BlockSpec((tb, d_out), lambda i: (i, 0)),
        compiler_params=pltpu.CompilerParams(
            dimension_semantics=("parallel",),     # independent batch tiles -> megacore shard
            vmem_limit_bytes=vmem_limit,
        ),
        cost_estimate=cost,
    )(x_p, w1, b1, w2, b2, w3, b3)

    return out_p if b_p == B else out_p[:B]


def init_params(key, input_size, hidden_size, output_size):
    """Deterministic init mimicking nn.Linear's uniform(-1/sqrt(in), 1/sqrt(in))."""
    ks = jax.random.split(key, 6)

    def lin(kw, kb, fan_in, fan_out):
        bound = 1.0 / jnp.sqrt(fan_in)
        w = jax.random.uniform(kw, (fan_in, fan_out), jnp.float32, -bound, bound)
        b = jax.random.uniform(kb, (1, fan_out), jnp.float32, -bound, bound)
        return w, b

    w1, b1 = lin(ks[0], ks[1], input_size, hidden_size)
    w2, b2 = lin(ks[2], ks[3], hidden_size, hidden_size)
    w3, b3 = lin(ks[4], ks[5], hidden_size, output_size)
    return dict(w1=w1, b1=b1, w2=w2, b2=b2, w3=w3, b3=b3)


if __name__ == "__main__":
    key = jax.random.PRNGKey(0)
    k_x, k_p = jax.random.split(key)

    batch, input_size, hidden_size, output_size = 8, 16, 32, 4
    x = jax.random.normal(k_x, (batch, input_size), jnp.float32)
    params = init_params(k_p, input_size, hidden_size, output_size)

    # Pure-JAX f32 reference with TorchModel semantics.
    ref = jnp.maximum(x @ params["w1"] + params["b1"], 0.0)
    ref = jnp.maximum(ref @ params["w2"] + params["b2"], 0.0)
    ref = jax.nn.sigmoid(ref @ params["w3"] + params["b3"])

    # 1) Exact-precision path (f32 weights on the MXU): tight check.
    prep_f32 = prepare_params(params, mxu_dtype=jnp.float32)
    out_f32 = jax.block_until_ready(torch_model_forward(x, prep_f32))
    assert out_f32.shape == (batch, output_size)
    assert jnp.allclose(out_f32, ref, atol=1e-5, rtol=1e-5)

    # 2) Default fast path (bf16 weights, f32 accumulation): bf16-precision tolerance.
    prep_bf16 = prepare_params(params)
    out_bf16 = jax.block_until_ready(torch_model_forward(x, prep_bf16))
    assert out_bf16.shape == (batch, output_size)
    assert jnp.allclose(out_bf16, ref, atol=2e-2, rtol=2e-2)

    print("KERNEL_OK")
</pallas_src>

<mosaic_0001>
module attributes {stable_mosaic.version = 11 : i64} {
  func.func @mlp_kernel(%arg0: i32, %arg1: memref<8x16xf32, #tpu.memory_space<vmem>>, %arg2: memref<16x128xf32, #tpu.memory_space<vmem>>, %arg3: memref<1x128xf32, #tpu.memory_space<vmem>>, %arg4: memref<128x128xf32, #tpu.memory_space<vmem>>, %arg5: memref<1x128xf32, #tpu.memory_space<vmem>>, %arg6: memref<128x4xf32, #tpu.memory_space<vmem>>, %arg7: memref<1x4xf32, #tpu.memory_space<vmem>>, %arg8: memref<8x4xf32, #tpu.memory_space<vmem>>) attributes {dimension_semantics = [#tpu.dimension_semantics<parallel>], iteration_bounds = array<i64: 1>, scalar_prefetch = 0 : i64, scratch_operands = 0 : i64, tpu.core_type = #tpu.core_type<tc>, window_params = [{transform_indices = @transform_0, window_bounds = array<i64: 8, 16>}, {pipeline_mode = #tpu.pipeline_mode<synchronous>, transform_indices = @transform_1, window_bounds = array<i64: 16, 128>}, {pipeline_mode = #tpu.pipeline_mode<synchronous>, transform_indices = @transform_2, window_bounds = array<i64: 1, 128>}, {pipeline_mode = #tpu.pipeline_mode<synchronous>, transform_indices = @transform_3, window_bounds = array<i64: 128, 128>}, {pipeline_mode = #tpu.pipeline_mode<synchronous>, transform_indices = @transform_4, window_bounds = array<i64: 1, 128>}, {pipeline_mode = #tpu.pipeline_mode<synchronous>, transform_indices = @transform_5, window_bounds = array<i64: 128, 4>}, {pipeline_mode = #tpu.pipeline_mode<synchronous>, transform_indices = @transform_6, window_bounds = array<i64: 1, 4>}, {transform_indices = @transform_7, window_bounds = array<i64: 8, 4>}]} {
    %c0 = arith.constant 0 : index
    %c0_0 = arith.constant 0 : index
    %0 = vector.load %arg1[%c0, %c0_0] : memref<8x16xf32, #tpu.memory_space<vmem>>, vector<8x16xf32>
    %c0_1 = arith.constant 0 : index
    %c0_2 = arith.constant 0 : index
    %1 = vector.load %arg2[%c0_1, %c0_2] : memref<16x128xf32, #tpu.memory_space<vmem>>, vector<16x128xf32>
    %cst = arith.constant dense<0.000000e+00> : vector<8x128xf32>
    %2 = tpu.matmul %0, %1, %cst {dimension_numbers = #tpu.dot_dimension_numbers<[1], [0], [0], [1], [0, 0, 1, 1], [], []>} : vector<8x16xf32>, vector<16x128xf32>, vector<8x128xf32> -> vector<8x128xf32>
    %c0_3 = arith.constant 0 : index
    %c0_4 = arith.constant 0 : index
    %3 = vector.load %arg3[%c0_3, %c0_4] : memref<1x128xf32, #tpu.memory_space<vmem>>, vector<1x128xf32>
    %4 = vector.broadcast %3 : vector<1x128xf32> to vector<8x128xf32>
    %5 = arith.addf %2, %4 : vector<8x128xf32>
    %cst_5 = arith.constant 0.000000e+00 : f32
    %6 = vector.broadcast %cst_5 : f32 to vector<8x128xf32>
    %7 = arith.maximumf %5, %6 : vector<8x128xf32>
    %c0_6 = arith.constant 0 : index
    %c0_7 = arith.constant 0 : index
    %8 = vector.load %arg4[%c0_6, %c0_7] : memref<128x128xf32, #tpu.memory_space<vmem>>, vector<128x128xf32>
    %cst_8 = arith.constant dense<0.000000e+00> : vector<8x128xf32>
    %9 = tpu.matmul %7, %8, %cst_8 {dimension_numbers = #tpu.dot_dimension_numbers<[1], [0], [0], [1], [0, 0, 1, 1], [], []>} : vector<8x128xf32>, vector<128x128xf32>, vector<8x128xf32> -> vector<8x128xf32>
    %c0_9 = arith.constant 0 : index
    %c0_10 = arith.constant 0 : index
    %10 = vector.load %arg5[%c0_9, %c0_10] : memref<1x128xf32, #tpu.memory_space<vmem>>, vector<1x128xf32>
    %11 = vector.broadcast %10 : vector<1x128xf32> to vector<8x128xf32>
    %12 = arith.addf %9, %11 : vector<8x128xf32>
    %cst_11 = arith.constant 0.000000e+00 : f32
    %13 = vector.broadcast %cst_11 : f32 to vector<8x128xf32>
    %14 = arith.maximumf %12, %13 : vector<8x128xf32>
    %c0_12 = arith.constant 0 : index
    %c0_13 = arith.constant 0 : index
    %15 = vector.load %arg6[%c0_12, %c0_13] : memref<128x4xf32, #tpu.memory_space<vmem>>, vector<128x4xf32>
    %cst_14 = arith.constant dense<0.000000e+00> : vector<8x4xf32>
    %16 = tpu.matmul %14, %15, %cst_14 {dimension_numbers = #tpu.dot_dimension_numbers<[1], [0], [0], [1], [0, 0, 1, 1], [], []>} : vector<8x128xf32>, vector<128x4xf32>, vector<8x4xf32> -> vector<8x4xf32>
    %c0_15 = arith.constant 0 : index
    %c0_16 = arith.constant 0 : index
    %17 = vector.load %arg7[%c0_15, %c0_16] : memref<1x4xf32, #tpu.memory_space<vmem>>, vector<1x4xf32>
    %18 = vector.broadcast %17 : vector<1x4xf32> to vector<8x4xf32>
    %19 = arith.addf %16, %18 : vector<8x4xf32>
    %cst_17 = arith.constant 5.000000e-01 : f32
    %20 = vector.broadcast %cst_17 : f32 to vector<8x4xf32>
    %21 = arith.mulf %20, %19 : vector<8x4xf32>
    %22 = math.tanh %21 : vector<8x4xf32>
    %cst_18 = arith.constant 5.000000e-01 : f32
    %23 = vector.broadcast %cst_18 : f32 to vector<8x4xf32>
    %24 = arith.mulf %23, %22 : vector<8x4xf32>
    %cst_19 = arith.constant 5.000000e-01 : f32
    %25 = vector.broadcast %cst_19 : f32 to vector<8x4xf32>
    %26 = arith.addf %24, %25 : vector<8x4xf32>
    %c0_20 = arith.constant 0 : index
    %c0_21 = arith.constant 0 : index
    %27 = vector.load %arg8[%c0_20, %c0_21] : memref<8x4xf32, #tpu.memory_space<vmem>>, vector<8x4xf32>
    tpu.vector_store %arg8[%c0_20, %c0_21], %26 {strides = array<i32>} : memref<8x4xf32, #tpu.memory_space<vmem>>, vector<8x4xf32>,
    return
  }
  func.func @transform_0(%arg0: i32) -> (i32, i32) {
    %c0_i32 = arith.constant 0 : i32
    %c0_i32_0 = arith.constant 0 : i32
    return %arg0, %c0_i32 : i32, i32
  }
  func.func @transform_1(%arg0: i32) -> (i32, i32) {
    %c0_i32 = arith.constant 0 : i32
    %c0_i32_0 = arith.constant 0 : i32
    %c0_i32_1 = arith.constant 0 : i32
    return %c0_i32, %c0_i32_0 : i32, i32
  }
  func.func @transform_2(%arg0: i32) -> (i32, i32) {
    %c0_i32 = arith.constant 0 : i32
    %c0_i32_0 = arith.constant 0 : i32
    %c0_i32_1 = arith.constant 0 : i32
    return %c0_i32, %c0_i32_0 : i32, i32
  }
  func.func @transform_3(%arg0: i32) -> (i32, i32) {
    %c0_i32 = arith.constant 0 : i32
    %c0_i32_0 = arith.constant 0 : i32
    %c0_i32_1 = arith.constant 0 : i32
    return %c0_i32, %c0_i32_0 : i32, i32
  }
  func.func @transform_4(%arg0: i32) -> (i32, i32) {
    %c0_i32 = arith.constant 0 : i32
    %c0_i32_0 = arith.constant 0 : i32
    %c0_i32_1 = arith.constant 0 : i32
    return %c0_i32, %c0_i32_0 : i32, i32
  }
  func.func @transform_5(%arg0: i32) -> (i32, i32) {
    %c0_i32 = arith.constant 0 : i32
    %c0_i32_0 = arith.constant 0 : i32
    %c0_i32_1 = arith.constant 0 : i32
    return %c0_i32, %c0_i32_0 : i32, i32
  }
  func.func @transform_6(%arg0: i32) -> (i32, i32) {
    %c0_i32 = arith.constant 0 : i32
    %c0_i32_0 = arith.constant 0 : i32
    %c0_i32_1 = arith.constant 0 : i32
    return %c0_i32, %c0_i32_0 : i32, i32
  }
  func.func @transform_7(%arg0: i32) -> (i32, i32) {
    %c0_i32 = arith.constant 0 : i32
    %c0_i32_0 = arith.constant 0 : i32
    return %arg0, %c0_i32 : i32, i32
  }
}

</mosaic_0001>

<bundles_post_ra>
// kernel: tpu_custom_call.1
= control target key start
LH: loop header
LB: loop body
LE: loop exit
PB: predicated region body
PF: predicated region fallthrough
CT: control target
= control target key end

     0   :  { %12 = vsyncpa [#allocation3], 0  ;;  %s524_s24 = smov [#allocation2]   ;;  %s713_s0 = inlined_call_operand.vmem [shape: f32[8,16], index: 0, kind: input, shape index: {}]   ;;  %s714_s1 = inlined_call_operand.hbm [shape: f32[16,128], index: 1, kind: input, shape index: {}]   ;;  %s715_s2 = inlined_call_operand.vmem [shape: f32[1,128], index: 2, kind: input, shape index: {}]   ;;  %s716_s3 = inlined_call_operand.vmem [shape: f32[128,128], index: 3, kind: input, shape index: {}]   ;;  %s717_s4 = inlined_call_operand.vmem [shape: f32[1,128], index: 4, kind: input, shape index: {}]   ;;  %s718_s5 = inlined_call_operand.vmem [shape: f32[128,4], index: 5, kind: input, shape index: {}]   ;;  %s719_s6 = inlined_call_operand.vmem [shape: f32[1,4], index: 6, kind: input, shape index: {}]   ;;  %s720_s7 = inlined_call_operand.vmem [shape: f32[8,4], index: 7, kind: output, shape index: {}]  }
   0x1   :  { %s20_s25 = sshll.u32 %s524_s24, 4  ;;  %s500_s28 = scalar_lea.hbm %s714_s1, 256  ;;  %s21_s25 = int_to_ptr.vmem [resolvable:$true] %s20_s25 }
   0x2   :  { %p501_p0 = scmp.ne.s32.totalorder %s714_s1, %s500_s28  ;;  %p504_p1 = scmp.lt.u32.totalorder %s500_s28, %s714_s1 }
   0x4   :  { %p506_p2 = pnand %p504_p1, %p501_p0 }
   0x6   :  { %509 = shalt.err (!%p506_p2)
}
   0x7   :  { %s510_s10 = scalar_lea.vmem %s21_s25, 256  ;;  %p515_p4 = scmp.lt.s32.totalorder %s21_s25, %s21_s25 }
   0x8   :  { %p511_p3 = scmp.ne.s32.totalorder %s21_s25, %s510_s10  ;;  %p516_p5 = scmp.lt.s32.totalorder %s510_s10, %s510_s10 }
   0xa   :  { %p517_p6 = por %p516_p5, %p515_p4 }
   0xc   :  { %p518_p7 = pnand %p517_p6, %p511_p3 }
   0xe   :  { %521 = shalt.err (!%p518_p7)
}
   0xf   :  { %s525_s11 = smov 128   ;;  %s526_s12 = smov 8  }
  0x10   :  { %26 = dma.hbm_to_vmem [thread:$0]  %s714_s1, 256, %s21_s25, [#allocation3], %s525_s11, %s525_s11, %s526_s12  }
  0x11   :  { %522 = dma.done.wait [#allocation3], 256  }
  0x12   :  { %523 = vsyncadd [#allocation3], 4294967040  ;;  %v527_v0 = vmov 0.0|0.0   ;;  %vm528_vm0 = vmmov 0   ;;  %v529_v1 = vmov 0.0   ;;  %v41_v2 = vld [vmem:[#allocation2] sm:$0xff] }
  0x13   :  { %441 = vmatprep.subr.bf16.mxu0 %v527_v0  ;;  %368 = vmatprep.mubr.msk.f32.mxu0 %vm528_vm0, %v529_v1  ;;  %v42_v3 = vld [vmem:[#allocation2 + $0x8] sm:$0xff]  ;;  %v125_v5 = vld [vmem:[%s716_s3] sm:$0xff]  ;;  %v127_v7 = vld [vmem:[%s716_s3 + $0x10] sm:$0xff]  ;;  %vm50_vm1 = vcmask 130048   ;;  %vm316_vm2 = vcmask 31744  }
  0x14   :  { %444 = vmatprep.subr.bf16.mxu1 %v527_v0  ;;  %403 = vmatprep.mubr.msk.f32.mxu1 %vm528_vm0, %v529_v1  ;;  %v442_v4 = vpack.c.bf16 %v42_v3, %v41_v2  ;;  %v126_v6 = vld [vmem:[%s716_s3 + $0x8] sm:$0xff]  ;;  %v128_v9 = vld [vmem:[%s716_s3 + $0x18] sm:$0xff]  ;;  %v40_v10 = vld [vmem:[%s713_s0] sm:$0xff] }
  0x15   :  { %v445_v8 = vpack.c.bf16 %v126_v6, %v125_v5  ;;  %v448_v11 = vpack.c.bf16 %v128_v9, %v127_v7  ;;  %v129_v12 = vld [vmem:[%s716_s3 + $0x20] sm:$0xff]  ;;  %v130_v13 = vld [vmem:[%s716_s3 + $0x28] sm:$0xff]  ;;  %v131_v15 = vld [vmem:[%s716_s3 + $0x30] sm:$0xff] }
  0x16   :  { %443 = vmatpush3.bf16.msra.mxu0 %v442_v4  ;;  %v451_v14 = vpack.c.bf16 %v130_v13, %v129_v12  ;;  %v132_v16 = vld [vmem:[%s716_s3 + $0x38] sm:$0xff]  ;;  %v133_v18 = vld [vmem:[%s716_s3 + $0x40] sm:$0xff]  ;;  %v134_v19 = vld [vmem:[%s716_s3 + $0x48] sm:$0xff] }
  0x17   :  { %446 = vmatpush3.bf16.msra.mxu1 %v445_v8  ;;  %468 = vmatprep.subr.bf16.mxu0 %v527_v0  ;;  %v454_v17 = vpack.c.bf16 %v132_v16, %v131_v15  ;;  %v457_v20 = vpack.c.bf16 %v134_v19, %v133_v18  ;;  %v135_v21 = vld [vmem:[%s716_s3 + $0x50] sm:$0xff]  ;;  %v136_v22 = vld [vmem:[%s716_s3 + $0x58] sm:$0xff]  ;;  %v137_v24 = vld [vmem:[%s716_s3 + $0x60] sm:$0xff] }
  0x18   :  { %447 = vmatprep.subr.bf16.mxu1 %v527_v0  ;;  %v460_v23 = vpack.c.bf16 %v136_v22, %v135_v21  ;;  %v138_v25 = vld [vmem:[%s716_s3 + $0x68] sm:$0xff]  ;;  %v139_v27 = vld [vmem:[%s716_s3 + $0x70] sm:$0xff]  ;;  %v140_v28 = vld [vmem:[%s716_s3 + $0x78] sm:$0xff] }
  0x19   :  { %369 = vmatmul.mubr.msk.f32.vlgmr.msra.gmra.mrb[0].mxu0 %vm50_vm1, %v40_v10  ;;  %v463_v26 = vpack.c.bf16 %v138_v25, %v137_v24  ;;  %v466_v29 = vpack.c.bf16 %v140_v28, %v139_v27  ;;  %v219_v30 = vld [vmem:[%s718_s5] sm:$0xff]  ;;  %v220_v31 = vld [vmem:[%s718_s5 + $0x8] sm:$0xff]  ;;  %v221_v32 = vld [vmem:[%s718_s5 + $0x10] sm:$0xff] }
  0x1a   :  { %438 = vmatprep.mubr.msk.f32.mxu0 %vm528_vm0, %v529_v1  ;;  %v469_v33 = vpack.c.bf16 %v220_v31, %v219_v30  ;;  %v222_v34 = vld [vmem:[%s718_s5 + $0x18] sm:$0xff]  ;;  %v223_v36 = vld [vmem:[%s718_s5 + $0x20] sm:$0xff]  ;;  %v224_v37 = vld [vmem:[%s718_s5 + $0x28] sm:$0xff] }
  0x1b   :  { %449 = vmatpush3.bf16.msra.mxu1 %v448_v11  ;;  %v472_v35 = vpack.c.bf16 %v222_v34, %v221_v32  ;;  %v475_v38 = vpack.c.bf16 %v224_v37, %v223_v36  ;;  %v225_v39 = vld [vmem:[%s718_s5 + $0x30] sm:$0xff]  ;;  %v226_v40 = vld [vmem:[%s718_s5 + $0x38] sm:$0xff]  ;;  %v227_v42 = vld [vmem:[%s718_s5 + $0x40] sm:$0xff] }
  0x1c   :  { %450 = vmatprep.subr.bf16.mxu1 %v527_v0  ;;  %470 = vmatpush3.bf16.msra.mxu0 %v469_v33  ;;  %v478_v41 = vpack.c.bf16 %v226_v40, %v225_v39  ;;  %v228_v43 = vld [vmem:[%s718_s5 + $0x48] sm:$0xff]  ;;  %v229_v45 = vld [vmem:[%s718_s5 + $0x50] sm:$0xff]  ;;  %v230_v46 = vld [vmem:[%s718_s5 + $0x58] sm:$0xff] }
  0x1d   :  { %471 = vmatprep.subr.bf16.mxu0 %v527_v0  ;;  %v481_v44 = vpack.c.bf16 %v228_v43, %v227_v42  ;;  %v484_v47 = vpack.c.bf16 %v230_v46, %v229_v45  ;;  %v231_v48 = vld [vmem:[%s718_s5 + $0x60] sm:$0xff]  ;;  %v232_v49 = vld [vmem:[%s718_s5 + $0x68] sm:$0xff]  ;;  %v233_v56 = vld [vmem:[%s718_s5 + $0x70] sm:$0xff] }
  0x1e   :  { %v487_v50 = vpack.c.bf16 %v232_v49, %v231_v48  ;;  %v323_v51 = vld [vmem:[%s715_s2] ss:$0 sm:$0xff]  ;;  %v234_v57 = vld [vmem:[%s718_s5 + $0x78] sm:$0xff] }
  0x1f   :  { %452 = vmatpush3.bf16.msra.mxu1 %v451_v14  ;;  %v490_v58 = vpack.c.bf16 %v234_v57, %v233_v56  ;;  %v325_v59 = vld [vmem:[%s717_s4] ss:$0 sm:$0xff] }
  0x20   :  { %453 = vmatprep.subr.bf16.mxu1 %v527_v0  ;;  %473 = vmatpush3.bf16.msra.mxu0 %v472_v35 }
  0x21   :  { %474 = vmatprep.subr.bf16.mxu0 %v527_v0 }
  0x23   :  { %455 = vmatpush3.bf16.msra.mxu1 %v454_v17 }
  0x24   :  { %456 = vmatprep.subr.bf16.mxu1 %v527_v0  ;;  %476 = vmatpush3.bf16.msra.mxu0 %v475_v38 }
  0x25   :  { %477 = vmatprep.subr.bf16.mxu0 %v527_v0 }
  0x27   :  { %458 = vmatpush3.bf16.msra.mxu1 %v457_v20 }
  0x28   :  { %459 = vmatprep.subr.bf16.mxu1 %v527_v0  ;;  %479 = vmatpush3.bf16.msra.mxu0 %v478_v41 }
  0x29   :  { %480 = vmatprep.subr.bf16.mxu0 %v527_v0 }
  0x2b   :  { %461 = vmatpush3.bf16.msra.mxu1 %v460_v23 }
  0x2c   :  { %462 = vmatprep.subr.bf16.mxu1 %v527_v0  ;;  %482 = vmatpush3.bf16.msra.mxu0 %v481_v44 }
  0x2d   :  { %483 = vmatprep.subr.bf16.mxu0 %v527_v0 }
  0x2f   :  { %464 = vmatpush3.bf16.msra.mxu1 %v463_v26 }
  0x30   :  { %465 = vmatprep.subr.bf16.mxu1 %v527_v0  ;;  %485 = vmatpush3.bf16.msra.mxu0 %v484_v47 }
  0x31   :  { %486 = vmatprep.subr.bf16.mxu0 %v527_v0 }
  0x33   :  { %467 = vmatpush3.bf16.msra.mxu1 %v466_v29 }
  0x34   :  { %488 = vmatpush3.bf16.msra.mxu0 %v487_v50 }
  0x35   :  { %489 = vmatprep.subr.bf16.mxu0 %v527_v0  ;;  %v326_v0 = vld [vmem:[%s719_s6] ss:$0 sm:$0xff] }
  0x38   :  { %491 = vmatpush3.bf16.msra.mxu0 %v490_v58 }
  0xec   :  { %v120_v52 = vpop.f32.mrb[0].mxu0 }
  0xed   :  { %v121_v53 = vadd.f32 %v323_v51, %v120_v52  ;;  %v370_v54 = vpop.f32.mrb[1].mxu0 }
  0xef   :  { %v124_v55 = vmax.f32 %v121_v53, 0.0 }
  0xf1   :  { %404 = vmatmul.mubr.f32.vlgmr.msra.gmra.mrb[0].mxu1 %v124_v55 }
 0x1c4   :  { %v214_v60 = vpop.f32.mrb[0].mxu1 }
 0x1c5   :  { %v215_v61 = vadd.f32 %v325_v59, %v214_v60  ;;  %v405_v62 = vpop.f32.mrb[1].mxu1 }
 0x1c7   :  { %v218_v63 = vmax.f32 %v215_v61, 0.0 }
 0x1c9   :  { %439 = vmatmul.mubr.f32.vlgmr.msra.gmra.mrb[2].mxu0 %v218_v63 }
 0x29c   :  { %v308_v1 = vpop.f32.mrb[2].mxu0 }
 0x29d   :  { %v309_v2 = vadd.f32 %v326_v0, %v308_v1  ;;  %v440_v3 = vpop.f32.mrb[3].mxu0 }
 0x29f   :  { %v312_v4 = vmul.f32 0.5, %v309_v2 }
 0x2a1   :  { %498 = vtanh.f32 %v312_v4 }
 0x2ab   :  { %v499_v5 = vpop.eup %498 }
 0x2ac   :  { %v314_v6 = vmul.f32 0.5, %v499_v5 }
 0x2ae   :  { %v315_v7 = vadd.f32 0.5, %v314_v6 }
 0x2b0   :  { %317 = vst.msk [vmem:[%s720_s7] sm:$0xff] %vm316_vm2, %v315_v7 }
 0x2b1   :  { %322 = vsyncpa [#allocation3], 1 }

</bundles_post_ra>
